<compile_context>
chip_gen: v5e
topology: v5e:2x2
jax: 0.10.0
libtpu: 0.0.40
codegen_flags: <defaults>
</compile_context>

<pallas_src>
import jax
import jax.numpy as jnp
from jax.experimental import pallas as pl
from jax.experimental.pallas import tpu as pltpu

NEG_SLOPE = 0.01  # PyTorch nn.LeakyReLU default


def _leaky_relu(x):
    # identical to where(x>0, x, 0.01*x) for 0 < slope < 1, one fewer VPU op
    return jnp.maximum(x, NEG_SLOPE * x)


def _round_up(x, m):
    return ((x + m - 1) // m) * m


def _choose_tb(batch):
    """Batch-tile rows.

    - tiny batch: single full-dim block (block == array dim is always legal)
    - moderate batch: >= 2 grid steps so both TensorCores get work on v7x,
      rounded to a 16-row (bf16 sublane) multiple
    - large batch: cap at 512 rows (good HBM-roofline fraction on v5e/v6e,
      safe for v7x's 64 MiB VMEM at typical H)
    """
    if batch <= 16:
        return batch
    tb = _round_up(pl.cdiv(batch, 2), 16)
    return min(tb, 512)


def _vmem_limit_bytes(tb, h, h2, o_pad):
    """Scoped-VMEM hint from the actual resident set (weights single-buffered,
    activations/outputs double-buffered, plus live intermediates)."""
    bf16, f32 = 2, 4
    weights = (2 * h * h + h * h2 + h2 * o_pad) * bf16          # Buffered(1)
    biases = (h + h2 + o_pad) * f32
    acts = 2 * (2 * tb * h * bf16)                              # x1, x2 double-buffered
    outs = 2 * tb * o_pad * f32                                 # output double-buffered
    live = tb * h * f32 + tb * h * bf16 + tb * h2 * bf16 + tb * o_pad * f32
    total = weights + biases + acts + outs + live
    # floor at the usual default, generous ceiling; plus slack for compiler scratch
    return max(32 << 20, min(int(total * 1.5) + (4 << 20), 110 << 20))


def classifier_kernel(x1_ref, x2_ref,
                      w1a_ref, w1b_ref, b1_ref,
                      w2_ref, b2_ref,
                      w3_ref, b3_ref,
                      o_ref):
    # --- fc1: split-W1 instead of concat(x1, x2) -------------------------------
    h = (jnp.dot(x1_ref[...], w1a_ref[...], preferred_element_type=jnp.float32)
         + jnp.dot(x2_ref[...], w1b_ref[...], preferred_element_type=jnp.float32))
    h = _leaky_relu(h + b1_ref[...]).astype(jnp.bfloat16)       # bf16 live value, [TB, H]

    # --- fc2 --------------------------------------------------------------------
    h = jnp.dot(h, w2_ref[...], preferred_element_type=jnp.float32)
    h = _leaky_relu(h + b2_ref[...]).astype(jnp.bfloat16)       # bf16, [TB, H/2]

    # --- fc3 + softmax (dim=1), numerically stable ------------------------------
    logits = jnp.dot(h, w3_ref[...], preferred_element_type=jnp.float32)
    logits = logits + b3_ref[...]                               # f32, [TB, O_pad]
    m = jnp.max(logits, axis=1, keepdims=True)
    e = jnp.exp(logits - m)                                     # padded lanes: exp(-1e30)=0
    inv = pl.reciprocal(jnp.sum(e, axis=1, keepdims=True), approx=True)  # EUP slot
    o_ref[...] = (e * inv).astype(o_ref.dtype)


def classifier_forward(input1, input2, params):
    """params = (w1, b1, w2, b2, w3, b3); w_i are [in, out], b_i are [1, out]."""
    w1, b1, w2, b2, w3, b3 = params
    B, H = input1.shape
    H2 = w2.shape[1]
    O = w3.shape[1]
    O_pad = _round_up(O, 128)                # lane-dense output store

    # ---- layout / dtype prep (outside the kernel; done by XLA) ----------------
    # split W1 so the kernel needs no concat along the lane axis
    w1a = w1[:H, :].astype(jnp.bfloat16)     # multiplies input1
    w1b = w1[H:, :].astype(jnp.bfloat16)     # multiplies input2
    w2b = w2.astype(jnp.bfloat16)
    # pad the output dim: zero weight columns, -1e30 bias -> softmax of the
    # padded classes is exactly 0 and the real classes are untouched.
    w3p = jnp.zeros((H2, O_pad), jnp.bfloat16).at[:, :O].set(w3.astype(jnp.bfloat16))
    b3p = jnp.full((1, O_pad), -1e30, jnp.float32).at[:, :O].set(b3.astype(jnp.float32))
    b1f = b1.astype(jnp.float32)
    b2f = b2.astype(jnp.float32)
    x1 = input1.astype(jnp.bfloat16)
    x2 = input2.astype(jnp.bfloat16)

    # ---- batch tiling -----------------------------------------------------------
    TB = _choose_tb(B)
    B_pad = _round_up(B, TB)                 # no ragged / masked last tile
    if B_pad != B:
        pad = B_pad - B
        x1 = jnp.pad(x1, ((0, pad), (0, 0)))
        x2 = jnp.pad(x2, ((0, pad), (0, 0)))
    grid = (B_pad // TB,)

    act_spec = lambda f: pl.BlockSpec((TB, f), lambda i: (i, 0))
    # grid-invariant blocks: single-buffer them (no point double-buffering a
    # block whose index_map never changes) -> halves resident weight VMEM.
    pin_spec = lambda r, c: pl.BlockSpec((r, c), lambda i: (0, 0),
                                         pipeline_mode=pl.Buffered(1))

    out_pad = pl.pallas_call(
        classifier_kernel,
        out_shape=jax.ShapeDtypeStruct((B_pad, O_pad), jnp.float32),
        grid_spec=pltpu.PrefetchScalarGridSpec(
            num_scalar_prefetch=0,
            grid=grid,
            in_specs=[
                act_spec(H),                 # x1
                act_spec(H),                 # x2
                pin_spec(H, H),              # W1a
                pin_spec(H, H),              # W1b
                pin_spec(1, H),              # b1
                pin_spec(H, H2),             # W2
                pin_spec(1, H2),             # b2
                pin_spec(H2, O_pad),         # W3 (padded)
                pin_spec(1, O_pad),          # b3 (padded)
            ],
            out_specs=pl.BlockSpec((TB, O_pad), lambda i: (i, 0)),
        ),
        compiler_params=pltpu.CompilerParams(
            dimension_semantics=("parallel",),   # shard batch over TCs on v7x
            vmem_limit_bytes=_vmem_limit_bytes(TB, H, H2, O_pad),
        ),
    )(x1, x2, w1a, w1b, b1f, w2b, b2f, w3p, b3p)

    return out_pad[:B, :O]


def init_params(key, hidden_size, output_size):
    """Deterministic init mimicking nn.Linear's shapes (stored as [in, out])."""
    h = hidden_size
    h2 = hidden_size // 2
    dims = [(2 * h, h), (h, h2), (h2, output_size)]
    params = []
    for (fan_in, fan_out) in dims:
        key, kw, kb = jax.random.split(key, 3)
        bound = 1.0 / jnp.sqrt(fan_in)
        w = jax.random.uniform(kw, (fan_in, fan_out), jnp.float32, -bound, bound)
        b = jax.random.uniform(kb, (1, fan_out), jnp.float32, -bound, bound)
        params.extend([w, b])
    return tuple(params)


def _reference(input1, input2, params):
    """Pure-JAX f32 reference matching the PyTorch forward."""
    w1, b1, w2, b2, w3, b3 = params
    x = jnp.concatenate([input1, input2], axis=1)
    h = jnp.where(x @ w1 + b1 > 0, x @ w1 + b1, NEG_SLOPE * (x @ w1 + b1))
    h = jnp.where(h @ w2 + b2 > 0, h @ w2 + b2, NEG_SLOPE * (h @ w2 + b2))
    return jax.nn.softmax(h @ w3 + b3, axis=1)


if __name__ == "__main__":
    hidden_size = 32
    output_size = 8
    batch = 2

    key = jax.random.PRNGKey(0)
    k1, k2, kp = jax.random.split(key, 3)
    input1 = jax.random.normal(k1, (batch, hidden_size), jnp.float32)
    input2 = jax.random.normal(k2, (batch, hidden_size), jnp.float32)
    params = init_params(kp, hidden_size, output_size)

    out = classifier_forward(input1, input2, params)
    out = jax.block_until_ready(out)

    ref = _reference(input1, input2, params)

    assert out.shape == (batch, output_size)
    # rows sum to ~1 (approx reciprocal + bf16 matmuls -> loose tolerance)
    assert jnp.allclose(jnp.sum(out, axis=1), 1.0, atol=1e-2)
    # matches the f32 reference within mixed-precision tolerance
    assert jnp.allclose(out, ref, atol=2e-2)

    print("KERNEL_OK")
</pallas_src>

<mosaic_0001>
module attributes {stable_mosaic.version = 11 : i64} {
  func.func @classifier_kernel(%arg0: i32, %arg1: memref<2x32xbf16, #tpu.memory_space<vmem>>, %arg2: memref<2x32xbf16, #tpu.memory_space<vmem>>, %arg3: memref<32x32xbf16, #tpu.memory_space<vmem>>, %arg4: memref<32x32xbf16, #tpu.memory_space<vmem>>, %arg5: memref<1x32xf32, #tpu.memory_space<vmem>>, %arg6: memref<32x16xbf16, #tpu.memory_space<vmem>>, %arg7: memref<1x16xf32, #tpu.memory_space<vmem>>, %arg8: memref<16x128xbf16, #tpu.memory_space<vmem>>, %arg9: memref<1x128xf32, #tpu.memory_space<vmem>>, %arg10: memref<2x128xf32, #tpu.memory_space<vmem>>) attributes {dimension_semantics = [#tpu.dimension_semantics<parallel>], iteration_bounds = array<i64: 1>, scalar_prefetch = 0 : i64, scratch_operands = 0 : i64, tpu.core_type = #tpu.core_type<tc>, window_params = [{transform_indices = @transform_0, window_bounds = array<i64: 2, 32>}, {transform_indices = @transform_1, window_bounds = array<i64: 2, 32>}, {pipeline_mode = #tpu.pipeline_mode<synchronous>, transform_indices = @transform_2, window_bounds = array<i64: 32, 32>}, {pipeline_mode = #tpu.pipeline_mode<synchronous>, transform_indices = @transform_3, window_bounds = array<i64: 32, 32>}, {pipeline_mode = #tpu.pipeline_mode<synchronous>, transform_indices = @transform_4, window_bounds = array<i64: 1, 32>}, {pipeline_mode = #tpu.pipeline_mode<synchronous>, transform_indices = @transform_5, window_bounds = array<i64: 32, 16>}, {pipeline_mode = #tpu.pipeline_mode<synchronous>, transform_indices = @transform_6, window_bounds = array<i64: 1, 16>}, {pipeline_mode = #tpu.pipeline_mode<synchronous>, transform_indices = @transform_7, window_bounds = array<i64: 16, 128>}, {pipeline_mode = #tpu.pipeline_mode<synchronous>, transform_indices = @transform_8, window_bounds = array<i64: 1, 128>}, {transform_indices = @transform_9, window_bounds = array<i64: 2, 128>}]} {
    %c0 = arith.constant 0 : index
    %c0_0 = arith.constant 0 : index
    %0 = vector.load %arg1[%c0, %c0_0] : memref<2x32xbf16, #tpu.memory_space<vmem>>, vector<2x32xbf16>
    %c0_1 = arith.constant 0 : index
    %c0_2 = arith.constant 0 : index
    %1 = vector.load %arg3[%c0_1, %c0_2] : memref<32x32xbf16, #tpu.memory_space<vmem>>, vector<32x32xbf16>
    %cst = arith.constant dense<0.000000e+00> : vector<2x32xf32>
    %2 = tpu.matmul %0, %1, %cst {dimension_numbers = #tpu.dot_dimension_numbers<[1], [0], [0], [1], [0, 0, 1, 1], [], []>} : vector<2x32xbf16>, vector<32x32xbf16>, vector<2x32xf32> -> vector<2x32xf32>
    %c0_3 = arith.constant 0 : index
    %c0_4 = arith.constant 0 : index
    %3 = vector.load %arg2[%c0_3, %c0_4] : memref<2x32xbf16, #tpu.memory_space<vmem>>, vector<2x32xbf16>
    %c0_5 = arith.constant 0 : index
    %c0_6 = arith.constant 0 : index
    %4 = vector.load %arg4[%c0_5, %c0_6] : memref<32x32xbf16, #tpu.memory_space<vmem>>, vector<32x32xbf16>
    %cst_7 = arith.constant dense<0.000000e+00> : vector<2x32xf32>
    %5 = tpu.matmul %3, %4, %cst_7 {dimension_numbers = #tpu.dot_dimension_numbers<[1], [0], [0], [1], [0, 0, 1, 1], [], []>} : vector<2x32xbf16>, vector<32x32xbf16>, vector<2x32xf32> -> vector<2x32xf32>
    %6 = arith.addf %2, %5 : vector<2x32xf32>
    %c0_8 = arith.constant 0 : index
    %c0_9 = arith.constant 0 : index
    %7 = vector.load %arg5[%c0_8, %c0_9] : memref<1x32xf32, #tpu.memory_space<vmem>>, vector<1x32xf32>
    %8 = vector.broadcast %7 : vector<1x32xf32> to vector<2x32xf32>
    %9 = arith.addf %6, %8 : vector<2x32xf32>
    %cst_10 = arith.constant 0.00999999977 : f32
    %10 = vector.broadcast %cst_10 : f32 to vector<2x32xf32>
    %11 = arith.mulf %10, %9 : vector<2x32xf32>
    %12 = arith.maximumf %9, %11 : vector<2x32xf32>
    %13 = arith.truncf %12 : vector<2x32xf32> to vector<2x32xbf16>
    %c0_11 = arith.constant 0 : index
    %c0_12 = arith.constant 0 : index
    %14 = vector.load %arg6[%c0_11, %c0_12] : memref<32x16xbf16, #tpu.memory_space<vmem>>, vector<32x16xbf16>
    %cst_13 = arith.constant dense<0.000000e+00> : vector<2x16xf32>
    %15 = tpu.matmul %13, %14, %cst_13 {dimension_numbers = #tpu.dot_dimension_numbers<[1], [0], [0], [1], [0, 0, 1, 1], [], []>} : vector<2x32xbf16>, vector<32x16xbf16>, vector<2x16xf32> -> vector<2x16xf32>
    %c0_14 = arith.constant 0 : index
    %c0_15 = arith.constant 0 : index
    %16 = vector.load %arg7[%c0_14, %c0_15] : memref<1x16xf32, #tpu.memory_space<vmem>>, vector<1x16xf32>
    %17 = vector.broadcast %16 : vector<1x16xf32> to vector<2x16xf32>
    %18 = arith.addf %15, %17 : vector<2x16xf32>
    %cst_16 = arith.constant 0.00999999977 : f32
    %19 = vector.broadcast %cst_16 : f32 to vector<2x16xf32>
    %20 = arith.mulf %19, %18 : vector<2x16xf32>
    %21 = arith.maximumf %18, %20 : vector<2x16xf32>
    %22 = arith.truncf %21 : vector<2x16xf32> to vector<2x16xbf16>
    %c0_17 = arith.constant 0 : index
    %c0_18 = arith.constant 0 : index
    %23 = vector.load %arg8[%c0_17, %c0_18] : memref<16x128xbf16, #tpu.memory_space<vmem>>, vector<16x128xbf16>
    %cst_19 = arith.constant dense<0.000000e+00> : vector<2x128xf32>
    %24 = tpu.matmul %22, %23, %cst_19 {dimension_numbers = #tpu.dot_dimension_numbers<[1], [0], [0], [1], [0, 0, 1, 1], [], []>} : vector<2x16xbf16>, vector<16x128xbf16>, vector<2x128xf32> -> vector<2x128xf32>
    %c0_20 = arith.constant 0 : index
    %c0_21 = arith.constant 0 : index
    %25 = vector.load %arg9[%c0_20, %c0_21] : memref<1x128xf32, #tpu.memory_space<vmem>>, vector<1x128xf32>
    %26 = vector.broadcast %25 : vector<1x128xf32> to vector<2x128xf32>
    %27 = arith.addf %24, %26 : vector<2x128xf32>
    %cst_22 = arith.constant dense<0xFF800000> : vector<2xf32>
    %28 = vector.multi_reduction <maximumf>, %27, %cst_22 [1] : vector<2x128xf32> to vector<2xf32>
    %29 = vector.shape_cast %28 : vector<2xf32> to vector<2x1xf32>
    %30 = vector.broadcast %29 : vector<2x1xf32> to vector<2x128xf32>
    %31 = arith.subf %27, %30 : vector<2x128xf32>
    %32 = math.exp %31 : vector<2x128xf32>
    %cst_23 = arith.constant dense<0.000000e+00> : vector<2xf32>
    %33 = vector.multi_reduction <add>, %32, %cst_23 [1] : vector<2x128xf32> to vector<2xf32>
    %34 = vector.shape_cast %33 : vector<2xf32> to vector<2x1xf32>
    %35 = tpu.reciprocal %34 {approx = true} : vector<2x1xf32> -> vector<2x1xf32>
    %36 = vector.broadcast %35 : vector<2x1xf32> to vector<2x128xf32>
    %37 = arith.mulf %32, %36 : vector<2x128xf32>
    %c0_24 = arith.constant 0 : index
    %c0_25 = arith.constant 0 : index
    %38 = vector.load %arg10[%c0_24, %c0_25] : memref<2x128xf32, #tpu.memory_space<vmem>>, vector<2x128xf32>
    tpu.vector_store %arg10[%c0_24, %c0_25], %37 {strides = array<i32>} : memref<2x128xf32, #tpu.memory_space<vmem>>, vector<2x128xf32>,
    return
  }
  func.func @transform_0(%arg0: i32) -> (i32, i32) {
    %c0_i32 = arith.constant 0 : i32
    %c0_i32_0 = arith.constant 0 : i32
    return %arg0, %c0_i32 : i32, i32
  }
  func.func @transform_1(%arg0: i32) -> (i32, i32) {
    %c0_i32 = arith.constant 0 : i32
    %c0_i32_0 = arith.constant 0 : i32
    return %arg0, %c0_i32 : i32, i32
  }
  func.func @transform_2(%arg0: i32) -> (i32, i32) {
    %c0_i32 = arith.constant 0 : i32
    %c0_i32_0 = arith.constant 0 : i32
    %c0_i32_1 = arith.constant 0 : i32
    return %c0_i32, %c0_i32_0 : i32, i32
  }
  func.func @transform_3(%arg0: i32) -> (i32, i32) {
    %c0_i32 = arith.constant 0 : i32
    %c0_i32_0 = arith.constant 0 : i32
    %c0_i32_1 = arith.constant 0 : i32
    return %c0_i32, %c0_i32_0 : i32, i32
  }
  func.func @transform_4(%arg0: i32) -> (i32, i32) {
    %c0_i32 = arith.constant 0 : i32
    %c0_i32_0 = arith.constant 0 : i32
    %c0_i32_1 = arith.constant 0 : i32
    return %c0_i32, %c0_i32_0 : i32, i32
  }
  func.func @transform_5(%arg0: i32) -> (i32, i32) {
    %c0_i32 = arith.constant 0 : i32
    %c0_i32_0 = arith.constant 0 : i32
    %c0_i32_1 = arith.constant 0 : i32
    return %c0_i32, %c0_i32_0 : i32, i32
  }
  func.func @transform_6(%arg0: i32) -> (i32, i32) {
    %c0_i32 = arith.constant 0 : i32
    %c0_i32_0 = arith.constant 0 : i32
    %c0_i32_1 = arith.constant 0 : i32
    return %c0_i32, %c0_i32_0 : i32, i32
  }
  func.func @transform_7(%arg0: i32) -> (i32, i32) {
    %c0_i32 = arith.constant 0 : i32
    %c0_i32_0 = arith.constant 0 : i32
    %c0_i32_1 = arith.constant 0 : i32
    return %c0_i32, %c0_i32_0 : i32, i32
  }
  func.func @transform_8(%arg0: i32) -> (i32, i32) {
    %c0_i32 = arith.constant 0 : i32
    %c0_i32_0 = arith.constant 0 : i32
    %c0_i32_1 = arith.constant 0 : i32
    return %c0_i32, %c0_i32_0 : i32, i32
  }
  func.func @transform_9(%arg0: i32) -> (i32, i32) {
    %c0_i32 = arith.constant 0 : i32
    %c0_i32_0 = arith.constant 0 : i32
    return %arg0, %c0_i32 : i32, i32
  }
}

</mosaic_0001>

<bundles_post_ra>
// kernel: tpu_custom_call.1
= control target key start
LH: loop header
LB: loop body
LE: loop exit
PB: predicated region body
PF: predicated region fallthrough
CT: control target
= control target key end

     0   :  { %14 = vsyncpa [#allocation3], 0  ;;  %s461_s0 = inlined_call_operand.vmem [shape: bf16[2,32], index: 0, kind: input, shape index: {}]   ;;  %s462_s1 = inlined_call_operand.hbm [shape: bf16[2,32], index: 1, kind: input, shape index: {}]   ;;  %s463_s2 = inlined_call_operand.vmem [shape: bf16[32,32], index: 2, kind: input, shape index: {}]   ;;  %s464_s3 = inlined_call_operand.hbm [shape: bf16[32,32], index: 3, kind: input, shape index: {}]   ;;  %s465_s4 = inlined_call_operand.vmem [shape: f32[1,32], index: 4, kind: input, shape index: {}]   ;;  %s466_s5 = inlined_call_operand.vmem [shape: bf16[32,16], index: 5, kind: input, shape index: {}]   ;;  %s467_s6 = inlined_call_operand.vmem [shape: f32[1,16], index: 6, kind: input, shape index: {}]   ;;  %s468_s7 = inlined_call_operand.vmem [shape: bf16[16,128], index: 7, kind: input, shape index: {}]   ;;  %s469_s8 = inlined_call_operand.vmem [shape: f32[1,128], index: 8, kind: input, shape index: {}]   ;;  %s470_s9 = inlined_call_operand.hbm [shape: f32[2,128], index: 9, kind: output, shape index: {}]  }
   0x1   :  { %15 = vsyncpa [#allocation6], 0 }
   0x2   :  { %16 = vsyncpa [#allocation4], 0  ;;  %s24_s11 = sshll.u32 %s462_s1, 4  ;;  %s367_s12 = smov [#allocation2]   ;;  %s25_s11 = int_to_ptr.hbm [resolvable:$true] %s24_s11 }
   0x3   :  { %s26_s13 = sshll.u32 %s367_s12, 4  ;;  %s36_s16 = sshll.u32 %s464_s3, 4  ;;  %s27_s13 = int_to_ptr.vmem [resolvable:$true] %s26_s13  ;;  %s37_s16 = int_to_ptr.hbm [resolvable:$true] %s36_s16 }
   0x4   :  { %29 = dma.hbm_to_vmem [thread:$0]  %s25_s11, 16, %s27_s13, [#allocation3]  }
   0x5   :  { %s368_s17 = smov [#allocation5]   ;;  %s369_s19 = smov 64  }
   0x6   :  { %s38_s18 = sshll.u32 %s368_s17, 4  ;;  %s370_s20 = smov 4   ;;  %s39_s18 = int_to_ptr.vmem [resolvable:$true] %s38_s18 }
   0x7   :  { %44 = dma.hbm_to_vmem [thread:$0]  %s37_s16, 256, %s39_s18, [#allocation6], %s369_s19, %s369_s19, %s370_s20  }
   0x8   :  { %361 = dma.done.wait [#allocation3], 16  }
   0x9   :  { %362 = vsyncadd [#allocation3], 4294967280 }
   0xa   :  { %363 = dma.done.wait [#allocation6], 256  }
   0xb   :  { %364 = vsyncadd [#allocation6], 4294967040  ;;  %v273_v0 = vld [vmem:[#allocation5 + $0x8] sm:$0xff]  ;;  %v272_v2 = vld [vmem:[#allocation5] sm:$0xff]  ;;  %vm86_vm0 = vcmask 261120   ;;  %vm190_vm1 = vcmask 130048  }
   0xc   :  { %v271_v1 = vld [vmem:[%s463_s2 + $0x8] sm:$0xff]  ;;  %v270_v3 = vld [vmem:[%s463_s2] sm:$0xff]  ;;  %96 = vmatpush.bf16.msra.mxu0 %v273_v0  ;;  %vm207_vm2 = vcmask 1041408  }
   0xd   :  { %124 = vmatpush.bf16.msra.mxu1 %v271_v1  ;;  %v69_v4 = vld [vmem:[#allocation2] sm:$0x1]  ;;  %v275_v6 = vld [vmem:[%s466_s5 + $0x8] sm:$0xff] }
   0xe   :  { %v64_v5 = vld [vmem:[%s461_s0] sm:$0x1]  ;;  %168 = vmatpush.bf16.msra.mxu2 %v275_v6 }
   0xf   :  { %v274_v7 = vld [vmem:[%s466_s5] sm:$0xff] }
  0x10   :  { %97 = vmatpush.bf16.msra.mxu0 %v272_v2  ;;  %v282_v8 = vld [vmem:[%s465_s4] ss:$0 sm:$0xff] }
  0x11   :  { %125 = vmatpush.bf16.msra.mxu1 %v270_v3  ;;  %v276_v18 = vld [vmem:[%s468_s7] sm:$0xff] }
  0x12   :  { %169 = vmatpush.bf16.msra.mxu2 %v274_v7  ;;  %201 = vmatpush.bf16.msra.mxu3 %v276_v18  ;;  %v283_v19 = vld [vmem:[%s467_s6] ss:$0 sm:$0xff]  ;;  %s371_s6 = smov [#allocation7]  }
  0x13   :  { %246 = vmatmul.msk.bf16.vlgmr.msra.gmra.mxu0 %vm86_vm0, %v69_v4  ;;  %v284_v26 = vld [vmem:[%s469_s8] ss:$0 sm:$0xff]  ;;  %s225_s7 = sshll.u32 %s371_s6, 4  ;;  %s227_s8 = sshll.u32 %s470_s9, 4  ;;  %s226_s7 = int_to_ptr.vmem [resolvable:$true] %s225_s7  ;;  %s228_s8 = int_to_ptr.hbm [resolvable:$true] %s227_s8 }
  0x14   :  { %255 = vmatmul.msk.bf16.vlgmr.msra.gmra.mxu1 %vm86_vm0, %v64_v5 }
  0x90   :  { %v99_v9 = vpop.f32.mrf.mxu0 }
  0x91   :  { %v127_v10 = vpop.f32.mrf.mxu1 }
  0x92   :  { %v128_v11 = vadd.f32 %v127_v10, %v99_v9 }
  0x94   :  { %v135_v12 = vadd.f32 %v282_v8, %v128_v11 }
  0x96   :  { %v136_v13 = vmul.f32 0.01, %v135_v12 }
  0x98   :  { %v137_v14 = vmax.f32 %v135_v12, %v136_v13  ;;  %v101_v15 = vpop.f32.mrf.mxu0 }
  0x99   :  { %v129_v16 = vpop.f32.mrf.mxu1 }
  0x9a   :  { %v138_v17 = vpack.c.bf16 %v137_v14, %v137_v14 }
  0x9c   :  { %264 = vmatmul.msk.bf16.vlgmr.msra.gmra.mxu2 %vm86_vm0, %v138_v17 }
 0x11f   :  { %v171_v20 = vpop.f32.mrf.mxu2 }
 0x120   :  { %v172_v21 = vadd.f32 %v283_v19, %v171_v20 }
 0x122   :  { %v175_v22 = vmul.f32 0.01, %v172_v21 }
 0x124   :  { %v176_v23 = vmax.f32 %v172_v21, %v175_v22 }
 0x126   :  { %v177_v24 = vpack.c.bf16 %v176_v23, %v176_v23 }
 0x127   :  { %v173_v25 = vpop.f32.mrf.mxu2 }
 0x128   :  { %269 = vmatmul.msk.bf16.vlgmr.msra.gmra.mxu3 %vm190_vm1, %v177_v24 }
 0x1ab   :  { %v203_v27 = vpop.f32.mrf.mxu3 }
 0x1ac   :  { %v204_v28 = vadd.f32 %v284_v26, %v203_v27 }
 0x1ae   :  { %v208_v29 = vsel %vm207_vm2, %v204_v28, -inf }
 0x1af   :  { %209 = vmax.xlane.f32.xlu0 %v208_v29 }
 0x1b3   :  { %v205_v30 = vpop.f32.mrf.mxu3 }
 0x222   :  { %v210_v31 = vpop.xlane.xlu0 %209 }
 0x223   :  { %v211_v32 = vsub.f32 %v204_v28, %v210_v31 }
 0x225   :  { %v212_v33 = vmul.f32 1.442695, %v211_v32 }
 0x227   :  { %285 = vpow2.f32 %v212_v33 }
 0x22d   :  { %v286_v34 = vpop.eup %285 }
 0x22e   :  { %v214_v35 = vsel %vm207_vm2, %v286_v34, 0.0 }
 0x22f   :  { %215 = vadd.xlane.f32.xlu0 %v214_v35 }
 0x2a2   :  { %v216_v36 = vpop.xlane.xlu0 %215 }
 0x2a3   :  { %287 = vrcp.f32 %v216_v36 }
 0x2a9   :  { %v288_v37 = vpop.eup %287 }
 0x2aa   :  { %v218_v38 = vmul.f32 %v288_v37, %v286_v34 }
 0x2ac   :  { %219 = vst [vmem:[#allocation7] sm:$0x3] %v218_v38 }
 0x2ad   :  { %230 = dma.vmem_to_hbm [thread:$0]  %s226_s7, 32, %s228_s8, [#allocation4]  }
 0x2ae   :  { %365 = dma.done.wait [#allocation4], 32  }
 0x2af   :  { %366 = vsyncadd [#allocation4], 4294967264 }
 0x2b0   :  { %235 = vsyncpa [#allocation3], 1 }
 0x2b1   :  { %236 = vsyncpa [#allocation6], 1 }
 0x2b2   :  { %237 = vsyncpa [#allocation4], 1 }

</bundles_post_ra>
